<compile_context>
chip_gen: v5e
topology: v5e:2x2
jax: 0.10.0
libtpu: 0.0.40
codegen_flags: <defaults>
</compile_context>

<pallas_src>
import functools

import jax
import jax.numpy as jnp
import numpy as np
from jax import lax
from jax.experimental import pallas as pl
from jax.experimental.pallas import tpu as pltpu


def _round_up(x, m):
    return ((x + m - 1) // m) * m


def _choose_tm(M, Cp, vmem_budget=40 << 20):
    """Row-tile size: multiple of 8, <= 512, VMEM-capped, minimal pad waste,
    and grid >= 2 whenever possible (v7x megacore)."""
    weights_bytes = 2 * 2 * (Cp * Cp * 4) + 2 * 2 * (8 * Cp * 4)   # 2x dbl-buffered W + b
    per_row_bytes = 16 * Cp * 4                                     # 2 in + 2 out, dbl-buffered
    tm_cap = (vmem_budget - weights_bytes) // per_row_bytes
    tm_cap = max(8, min(512, (tm_cap // 8) * 8))
    m8 = _round_up(max(M, 1), 8)
    best_tm, best_key = 8, None
    for tm in range(8, min(tm_cap, m8) + 1, 8):
        m_pad = _round_up(m8, tm)
        grid = m_pad // tm
        key = (m_pad - M, 0 if grid >= 2 else 1, -tm)
        if best_key is None or key < best_key:
            best_tm, best_key = tm, key
    return best_tm


def freqfilter_kernel(xr_ref, xi_ref, wr_ref, wi_ref, br_ref, bi_ref,
                      or_ref, oi_ref):
    xr = xr_ref[...]                                                   # [TM, Cp]
    xi = xi_ref[...]                                                   # [TM, Cp]
    # Fused weight stage: combined = (Re(X) @ W_f^T + b_f) @ w  ==  Re(X) @ Weff + beff
    cr = jnp.dot(xr, wr_ref[...], preferred_element_type=jnp.float32) + br_ref[...]
    ci = jnp.dot(xr, wi_ref[...], preferred_element_type=jnp.float32) + bi_ref[...]
    # Complex multiply X * combined; direct full-tile, lane-dense stores.
    or_ref[...] = xr * cr - xi * ci
    oi_ref[...] = xr * ci + xi * cr


def freq_filter_multihead(x, complex_weight, filt_w, filt_b):
    """mode='self' forward.
    x:              [B, N, C] float32
    complex_weight: [H, C, 2] float32   (torch view_as_complex layout)
    filt_w:         [H, C]    float32   (PyTorch nn.Linear weight)
    filt_b:         [H]       float32   (PyTorch nn.Linear bias)
    """
    # TODO(synk): mode='pool' (max-pool over heads with index gather) is not
    # implemented here; only the default-style 'self' mode is ported.
    B, N, C = x.shape
    H = complex_weight.shape[0]

    # TODO(synk): rfft/irfft have no Pallas TPU primitive; they stay in XLA.
    xc = jnp.fft.rfft(x.astype(jnp.float32), axis=1, norm='ortho')     # [B, F, C]
    Fr = xc.shape[1]
    M = B * Fr

    Cp = _round_up(C, 128)          # lane-dense column count
    TM = _choose_tm(M, Cp)
    M_pad = _round_up(M, TM)
    pad_r, pad_c = M_pad - M, Cp - C

    # Real / imag as separate lane-dense arrays (no packed concat round trip).
    xr = jnp.real(xc).reshape(M, C)
    xi = jnp.imag(xc).reshape(M, C)
    if pad_r or pad_c:
        # Zero rows/cols are numerically harmless (their outputs are zero and
        # sliced away); for C % 128 == 0 and well-sized M this pad vanishes.
        xr = jnp.pad(xr, ((0, pad_r), (0, pad_c)))
        xi = jnp.pad(xi, ((0, pad_r), (0, pad_c)))

    # Fold the two weight stages into one effective matmul (computed once, tiny).
    wr = complex_weight[..., 0].astype(jnp.float32)                    # [H, C]
    wi = complex_weight[..., 1].astype(jnp.float32)                    # [H, C]
    ft = filt_w.T.astype(jnp.float32)                                  # [C, H]
    fb = filt_b.astype(jnp.float32).reshape(1, H)                      # [1, H]
    weff_r, weff_i = ft @ wr, ft @ wi                                  # [C, C]
    beff_r, beff_i = fb @ wr, fb @ wi                                  # [1, C]
    if pad_c:
        weff_r = jnp.pad(weff_r, ((0, pad_c), (0, pad_c)))
        weff_i = jnp.pad(weff_i, ((0, pad_c), (0, pad_c)))
        beff_r = jnp.pad(beff_r, ((0, 0), (0, pad_c)))
        beff_i = jnp.pad(beff_i, ((0, 0), (0, pad_c)))

    grid = (M_pad // TM,)
    cost = pl.CostEstimate(
        flops=2 * (2 * M_pad * Cp * Cp) + 8 * M_pad * Cp,
        transcendentals=0,
        bytes_accessed=4 * M_pad * Cp * 4 + 2 * Cp * Cp * 4 + 2 * Cp * 4,
    )

    row_spec = pl.BlockSpec((TM, Cp), lambda i: (i, 0))
    wgt_spec = pl.BlockSpec((Cp, Cp), lambda i: (0, 0))
    bias_spec = pl.BlockSpec((1, Cp), lambda i: (0, 0))

    out_r, out_i = pl.pallas_call(
        freqfilter_kernel,
        out_shape=(jax.ShapeDtypeStruct((M_pad, Cp), jnp.float32),
                   jax.ShapeDtypeStruct((M_pad, Cp), jnp.float32)),
        grid=grid,
        in_specs=[row_spec, row_spec, wgt_spec, wgt_spec, bias_spec, bias_spec],
        out_specs=(row_spec, row_spec),
        compiler_params=pltpu.CompilerParams(
            dimension_semantics=("parallel",),
            vmem_limit_bytes=48 << 20),
        cost_estimate=cost,
    )(xr, xi, weff_r, weff_i, beff_r, beff_i)

    out_c = lax.complex(out_r[:M, :C], out_i[:M, :C]).reshape(B, Fr, C)
    return jnp.fft.irfft(out_c, n=N, axis=1, norm='ortho')


def reference(x, complex_weight, filt_w, filt_b):
    """Pure-JAX reference mirroring the PyTorch forward (mode='self')."""
    B, N, C = x.shape
    xc = jnp.fft.rfft(x.astype(jnp.float32), axis=1, norm='ortho')     # [B, F, C]
    hw = jnp.real(xc) @ filt_w.T + filt_b                              # [B, F, H]
    w = complex_weight[..., 0] + 1j * complex_weight[..., 1]           # [H, C]
    xrep = xc[:, :, None, :] * w[None, None, :, :]                     # [B, F, H, C]
    xw = xrep * hw[..., None].astype(jnp.complex64)
    xs = jnp.sum(xw, axis=-2)                                          # [B, F, C]
    return jnp.fft.irfft(xs, n=N, axis=1, norm='ortho')


if __name__ == "__main__":
    key = jax.random.PRNGKey(0)
    B, N, C, H = 2, 8, 32, 4          # batch=2, seq=8, length(C)=32, head=4
    k1, k2, k3, k4 = jax.random.split(key, 4)

    x = jax.random.normal(k1, (B, N, C), dtype=jnp.float32)
    # Deterministic parameter init (shapes follow the module's __init__).
    complex_weight = 0.02 * jax.random.normal(k2, (H, C, 2), dtype=jnp.float32)
    filt_w = (1.0 / jnp.sqrt(jnp.float32(C))) * jax.random.normal(
        k3, (H, C), dtype=jnp.float32)
    filt_b = 0.01 * jax.random.normal(k4, (H,), dtype=jnp.float32)

    out = freq_filter_multihead(x, complex_weight, filt_w, filt_b)
    out = jax.block_until_ready(out)

    ref = reference(x, complex_weight, filt_w, filt_b)
    np.testing.assert_allclose(np.asarray(out), np.asarray(ref),
                               rtol=1e-4, atol=1e-5)
    print("KERNEL_OK")
</pallas_src>

<mosaic_0001>
module attributes {stable_mosaic.version = 11 : i64} {
  func.func @freqfilter_kernel(%arg0: i32, %arg1: memref<8x128xf32, #tpu.memory_space<vmem>>, %arg2: memref<8x128xf32, #tpu.memory_space<vmem>>, %arg3: memref<128x128xf32, #tpu.memory_space<vmem>>, %arg4: memref<128x128xf32, #tpu.memory_space<vmem>>, %arg5: memref<1x128xf32, #tpu.memory_space<vmem>>, %arg6: memref<1x128xf32, #tpu.memory_space<vmem>>, %arg7: memref<8x128xf32, #tpu.memory_space<vmem>>, %arg8: memref<8x128xf32, #tpu.memory_space<vmem>>) attributes {dimension_semantics = [#tpu.dimension_semantics<parallel>], iteration_bounds = array<i64: 2>, scalar_prefetch = 0 : i64, scratch_operands = 0 : i64, tpu.core_type = #tpu.core_type<tc>, window_params = [{transform_indices = @transform_0, window_bounds = array<i64: 8, 128>}, {transform_indices = @transform_1, window_bounds = array<i64: 8, 128>}, {pipeline_mode = #tpu.pipeline_mode<synchronous>, transform_indices = @transform_2, window_bounds = array<i64: 128, 128>}, {pipeline_mode = #tpu.pipeline_mode<synchronous>, transform_indices = @transform_3, window_bounds = array<i64: 128, 128>}, {pipeline_mode = #tpu.pipeline_mode<synchronous>, transform_indices = @transform_4, window_bounds = array<i64: 1, 128>}, {pipeline_mode = #tpu.pipeline_mode<synchronous>, transform_indices = @transform_5, window_bounds = array<i64: 1, 128>}, {transform_indices = @transform_6, window_bounds = array<i64: 8, 128>}, {transform_indices = @transform_7, window_bounds = array<i64: 8, 128>}]} {
    %c0 = arith.constant 0 : index
    %c0_0 = arith.constant 0 : index
    %0 = vector.load %arg1[%c0, %c0_0] : memref<8x128xf32, #tpu.memory_space<vmem>>, vector<8x128xf32>
    %c0_1 = arith.constant 0 : index
    %c0_2 = arith.constant 0 : index
    %1 = vector.load %arg2[%c0_1, %c0_2] : memref<8x128xf32, #tpu.memory_space<vmem>>, vector<8x128xf32>
    %c0_3 = arith.constant 0 : index
    %c0_4 = arith.constant 0 : index
    %2 = vector.load %arg3[%c0_3, %c0_4] : memref<128x128xf32, #tpu.memory_space<vmem>>, vector<128x128xf32>
    %cst = arith.constant dense<0.000000e+00> : vector<8x128xf32>
    %3 = tpu.matmul %0, %2, %cst {dimension_numbers = #tpu.dot_dimension_numbers<[1], [0], [0], [1], [0, 0, 1, 1], [], []>} : vector<8x128xf32>, vector<128x128xf32>, vector<8x128xf32> -> vector<8x128xf32>
    %c0_5 = arith.constant 0 : index
    %c0_6 = arith.constant 0 : index
    %4 = vector.load %arg5[%c0_5, %c0_6] : memref<1x128xf32, #tpu.memory_space<vmem>>, vector<1x128xf32>
    %5 = vector.broadcast %4 : vector<1x128xf32> to vector<8x128xf32>
    %6 = arith.addf %3, %5 : vector<8x128xf32>
    %c0_7 = arith.constant 0 : index
    %c0_8 = arith.constant 0 : index
    %7 = vector.load %arg4[%c0_7, %c0_8] : memref<128x128xf32, #tpu.memory_space<vmem>>, vector<128x128xf32>
    %cst_9 = arith.constant dense<0.000000e+00> : vector<8x128xf32>
    %8 = tpu.matmul %0, %7, %cst_9 {dimension_numbers = #tpu.dot_dimension_numbers<[1], [0], [0], [1], [0, 0, 1, 1], [], []>} : vector<8x128xf32>, vector<128x128xf32>, vector<8x128xf32> -> vector<8x128xf32>
    %c0_10 = arith.constant 0 : index
    %c0_11 = arith.constant 0 : index
    %9 = vector.load %arg6[%c0_10, %c0_11] : memref<1x128xf32, #tpu.memory_space<vmem>>, vector<1x128xf32>
    %10 = vector.broadcast %9 : vector<1x128xf32> to vector<8x128xf32>
    %11 = arith.addf %8, %10 : vector<8x128xf32>
    %12 = arith.mulf %0, %6 : vector<8x128xf32>
    %13 = arith.mulf %1, %11 : vector<8x128xf32>
    %14 = arith.subf %12, %13 : vector<8x128xf32>
    %c0_12 = arith.constant 0 : index
    %c0_13 = arith.constant 0 : index
    %15 = vector.load %arg7[%c0_12, %c0_13] : memref<8x128xf32, #tpu.memory_space<vmem>>, vector<8x128xf32>
    tpu.vector_store %arg7[%c0_12, %c0_13], %14 {strides = array<i32>} : memref<8x128xf32, #tpu.memory_space<vmem>>, vector<8x128xf32>,
    %16 = arith.mulf %0, %11 : vector<8x128xf32>
    %17 = arith.mulf %1, %6 : vector<8x128xf32>
    %18 = arith.addf %16, %17 : vector<8x128xf32>
    %c0_14 = arith.constant 0 : index
    %c0_15 = arith.constant 0 : index
    %19 = vector.load %arg8[%c0_14, %c0_15] : memref<8x128xf32, #tpu.memory_space<vmem>>, vector<8x128xf32>
    tpu.vector_store %arg8[%c0_14, %c0_15], %18 {strides = array<i32>} : memref<8x128xf32, #tpu.memory_space<vmem>>, vector<8x128xf32>,
    return
  }
  func.func @transform_0(%arg0: i32) -> (i32, i32) {
    %c0_i32 = arith.constant 0 : i32
    %c0_i32_0 = arith.constant 0 : i32
    return %arg0, %c0_i32 : i32, i32
  }
  func.func @transform_1(%arg0: i32) -> (i32, i32) {
    %c0_i32 = arith.constant 0 : i32
    %c0_i32_0 = arith.constant 0 : i32
    return %arg0, %c0_i32 : i32, i32
  }
  func.func @transform_2(%arg0: i32) -> (i32, i32) {
    %c0_i32 = arith.constant 0 : i32
    %c0_i32_0 = arith.constant 0 : i32
    %c0_i32_1 = arith.constant 0 : i32
    return %c0_i32, %c0_i32_0 : i32, i32
  }
  func.func @transform_3(%arg0: i32) -> (i32, i32) {
    %c0_i32 = arith.constant 0 : i32
    %c0_i32_0 = arith.constant 0 : i32
    %c0_i32_1 = arith.constant 0 : i32
    return %c0_i32, %c0_i32_0 : i32, i32
  }
  func.func @transform_4(%arg0: i32) -> (i32, i32) {
    %c0_i32 = arith.constant 0 : i32
    %c0_i32_0 = arith.constant 0 : i32
    %c0_i32_1 = arith.constant 0 : i32
    return %c0_i32, %c0_i32_0 : i32, i32
  }
  func.func @transform_5(%arg0: i32) -> (i32, i32) {
    %c0_i32 = arith.constant 0 : i32
    %c0_i32_0 = arith.constant 0 : i32
    %c0_i32_1 = arith.constant 0 : i32
    return %c0_i32, %c0_i32_0 : i32, i32
  }
  func.func @transform_6(%arg0: i32) -> (i32, i32) {
    %c0_i32 = arith.constant 0 : i32
    %c0_i32_0 = arith.constant 0 : i32
    return %arg0, %c0_i32 : i32, i32
  }
  func.func @transform_7(%arg0: i32) -> (i32, i32) {
    %c0_i32 = arith.constant 0 : i32
    %c0_i32_0 = arith.constant 0 : i32
    return %arg0, %c0_i32 : i32, i32
  }
}

</mosaic_0001>

<bundles_post_ra>
// kernel: tpu_custom_call.1
= control target key start
LH: loop header
LB: loop body
LE: loop exit
PB: predicated region body
PF: predicated region fallthrough
CT: control target
= control target key end

     0   :  { %s1246_s0 = inlined_call_operand.hbm [shape: f32[16,128], index: 0, kind: input, shape index: {}]   ;;  %s1247_s1 = inlined_call_operand.hbm [shape: f32[16,128], index: 1, kind: input, shape index: {}]   ;;  %s1248_s2 = inlined_call_operand.hbm [shape: f32[128,128], index: 2, kind: input, shape index: {}]   ;;  %s1249_s3 = inlined_call_operand.hbm [shape: f32[128,128], index: 3, kind: input, shape index: {}]   ;;  %s1250_s4 = inlined_call_operand.vmem [shape: f32[1,128], index: 4, kind: input, shape index: {}]   ;;  %s1251_s5 = inlined_call_operand.vmem [shape: f32[1,128], index: 5, kind: input, shape index: {}]   ;;  %s1252_s6 = inlined_call_operand.hbm [shape: f32[16,128], index: 6, kind: output, shape index: {0}]   ;;  %s1253_s7 = inlined_call_operand.hbm [shape: f32[16,128], index: 7, kind: output, shape index: {1}]  }
   0x1   :  { %1258 = sst [smem:[#allocation23_spill]] %s1248_s2 }
   0x2   :  { %1259 = sst [smem:[#allocation24_spill]] %s1249_s3 }
   0x3   :  { %13 = vsyncpa [#allocation3], 0 }
   0x4   :  { %15 = vsyncpa [#allocation3 + $0x1], 0 }
   0x5   :  { %16 = vsyncpa [#allocation6], 0 }
   0x6   :  { %18 = vsyncpa [#allocation6 + $0x1], 0 }
   0x7   :  { %19 = vsyncpa [#allocation9], 0 }
   0x8   :  { %20 = vsyncpa [#allocation4], 0 }
   0x9   :  { %22 = vsyncpa [#allocation4 + $0x1], 0 }
   0xa   :  { %23 = vsyncpa [#allocation12], 0 }
   0xb   :  { %25 = vsyncpa [#allocation12 + $0x1], 0  ;;  %s1028_s24 = smov 0   ;;  %s1030_s25 = smov 0  }
   0xc   :  { %s1032_s26 = smov 0   ;;  %s1034_s27 = smov 0  }
   0xd LB: > { %1260 = sst [smem:[#allocation19_spill]] %s978_s26  ;;  %s1052_s8 = sadd.s32 4294967295, %s982_s27   ;;  %s982_s27 = sphi %s1034_s27, %s1274_s27   ;;  %s978_s26 = sphi %s1032_s26, %s1276_s26   ;;  %s974_s25 = sphi %s1030_s25, %s1278_s25   ;;  %s970_s24 = sphi %s1028_s24, %s1277_s24  }
   0xe   : > { %1261 = sst [smem:[#allocation20_spill]] %s982_s27  ;;  %p650_p0 = scmp.ge.s32.totalorder %s982_s27, 1 }
   0xf   : > { %s1262_s2 = sld [smem:[#allocation23_spill]]  ;;  %p52_p1 = scmp.eq.s32.totalorder %s1052_s8, 0 }
  0x10   : > { %p224_p2 = scmp.lt.s32.totalorder %s982_s27, 3  ;;  %s984_s10 = smov [#allocation7]  }
  0x11   : > { %s237_s11 = sshll.u32 %s984_s10, 4  ;;  %s1264_s3 = sld [smem:[#allocation24_spill]]  ;;  %s238_s11 = int_to_ptr.vmem [resolvable:$true] %s237_s11 }
  0x12   : > { %p1057_p3 = pnand %p650_p0, %p224_p2  ;;  %s985_s15 = smov [#allocation8]  }
  0x13   : > { %s251_s16 = sshll.u32 %s985_s15, 4  ;;  %s986_s17 = smov 128   ;;  %s252_s16 = int_to_ptr.vmem [resolvable:$true] %s251_s16 }
  0x14   : > { %p687_p4 = pneg %p1057_p3  ;;  %s987_s18 = smov 8  }
  0x15   : > { %s235_s30 = sshll.u32 %s1262_s2, 4  ;;  %s649_s19 = sadd.s32 4294967294, %s982_s27   ;;  %s236_s30 = int_to_ptr.hbm [resolvable:$true] %s235_s30 }
  0x16   : > { %p688_p6 = pnand %p687_p4, %p52_p1  ;;  %s1071_s20 = sadd.s32 1, %s982_s27  }
  0x17   : > { %s249_s14 = sshll.u32 %s1264_s3, 4  ;;  %1265 = sst [smem:[#allocation21_spill]] %s1071_s20  ;;  %s250_s14 = int_to_ptr.hbm [resolvable:$true] %s249_s14 }
  0x18   : > { %690 = dma.hbm_to_vmem [thread:$0]  (!%p688_p6), %s236_s30, 2048, %s238_s11, [#allocation6], %s986_s17, %s986_s17, %s987_s18  }
  0x19   : > { %693 = dma.hbm_to_vmem [thread:$0]  (!%p688_p6), %s250_s14, 2048, %s252_s16, [#allocation9], %s986_s17, %s986_s17, %s987_s18  }
  0x1a   : > { %s35_s21 = ssub.s32 %s982_s27, %s1071_s20  ;;  %s38_s22 = sadd.s32 1, %s978_s26 }
  0x1b   : > { %p36_p7 = scmp.eq.s32.totalorder %s35_s21, 0  ;;  %p45_p8 = scmp.ne.s32.totalorder %s978_s26, %s974_s25 }
  0x1c   : > { %p46_p9 = scmp.eq.s32.totalorder %s982_s27, 0  ;;  %p51_p10 = scmp.ne.s32.totalorder %s974_s25, %s970_s24 }
  0x1d   : > { %s1082_s23 = scalar_select %p36_p7, %s978_s26, %s38_s22  }
  0x1e   : > { %p1084_p11 = por %p46_p9, %p45_p8  ;;  %p1090_p12 = por %p52_p1, %p51_p10 }
  0x1f   : > { %1266 = sst [smem:[#allocation22_spill]] %s1082_s23  ;;  %p185_p13 = scmp.eq.s32.totalorder %s1052_s8, 1 }
  0x20   : > { %p191_p0 = scmp.eq.s32.totalorder %s649_s19, 1  ;;  %p710_p2 = scmp.lt.s32.totalorder %s982_s27, 2 }
  0x21   : > { %s271_s30 = sand.u32 1, %s978_s26   ;;  %p1097_p4 = por %p185_p13, %p45_p8 }
  0x22   : > { %p1101_p6 = por %p191_p0, %p51_p10  ;;  %s1105_s12 = sshll.u32 %s271_s30, 3 }
  0x23   : > { %s655_s13 = sshll.u32 %s982_s27, 3  ;;  %s275_s17 = scalar_lea.vmem [#allocation2], %s1105_s12 }
  0x24   : > { %s279_s16 = scalar_lea.hbm %s1246_s0, %s655_s13  ;;  %s283_s18 = sshll.u32 %s275_s17, 4  ;;  %s284_s18 = int_to_ptr.vmem [resolvable:$true] %s283_s18 }
  0x25   : > { %s281_s19 = sshll.u32 %s279_s16, 4  ;;  %p1114_p7 = pnand %p710_p2, %p1084_p11  ;;  %s282_s19 = int_to_ptr.hbm [resolvable:$true] %s281_s19 }
  0x26   : > { %s298_s3 = scalar_lea.hbm %s1247_s1, %s655_s13  ;;  %s290_s23 = sand.u32 1, %s982_s27  }
  0x27   : > { %s272_s26 = scalar_lea.sflag [#allocation3], %s271_s30  ;;  %s812_s14 = sshra.s32 %s282_s19, 4  ;;  %s813_s14 = int_to_ptr.hbm [resolvable:$true] %s812_s14 }
  0x28   : > { %s814_s15 = scalar_lea.hbm %s813_s14, 8  ;;  %p816_p9 = pneg %p1114_p7 }
  0x29   : > { %p815_p8 = scmp.ne.s32.totalorder %s813_s14, %s814_s15  ;;  %s819_s17 = scalar_lea.hbm %s1246_s0, 16 }
  0x2a   : > { %p820_p13 = scmp.lt.s32.totalorder %s813_s14, %s1246_s0  ;;  %p821_p0 = scmp.lt.s32.totalorder %s819_s17, %s814_s15 }
  0x2b   : > { %p817_p10 = pnand %p816_p9, %p815_p8 }
  0x2c   : > { %p822_p2 = por %p821_p0, %p820_p13 }
  0x2d   : > { %p818_p11 = pneg %p817_p10 }
  0x2f   : > { %p823_p5 = pnand %p822_p2, %p818_p11 }
  0x31   : > { %826 = shalt.err (!%p823_p5)
}
  0x32   : > { %697 = dma.hbm_to_vmem [thread:$0]  (!%p1114_p7), %s282_s19, 128, %s284_s18, %s272_s26  }
  0x33   : > { %s300_s30 = sshll.u32 %s298_s3, 4  ;;  %s294_s13 = scalar_lea.vmem [#allocation5], %s1105_s12  ;;  %s301_s30 = int_to_ptr.hbm [resolvable:$true] %s300_s30 }
  0x34   : > { %s302_s20 = sshll.u32 %s294_s13, 4  ;;  %s291_s28 = scalar_lea.sflag [#allocation6], %s290_s23  ;;  %s303_s20 = int_to_ptr.vmem [resolvable:$true] %s302_s20 }
  0x35   : > { %s842_s16 = sshra.s32 %s301_s30, 4  ;;  %s849_s17 = scalar_lea.hbm %s1247_s1, 16  ;;  %s843_s16 = int_to_ptr.hbm [resolvable:$true] %s842_s16 }
  0x36   : > { %s844_s27 = scalar_lea.hbm %s843_s16, 8  ;;  %p850_p5 = scmp.lt.s32.totalorder %s843_s16, %s1247_s1 }
  0x37   : > { %p845_p8 = scmp.ne.s32.totalorder %s843_s16, %s844_s27  ;;  %p851_p13 = scmp.lt.s32.totalorder %s849_s17, %s844_s27 }
  0x39   : > { %p847_p10 = pnand %p845_p8, %p816_p9  ;;  %p852_p0 = por %p851_p13, %p850_p5 }
  0x3b   : > { %p848_p11 = pneg %p847_p10 }
  0x3d   : > { %p853_p2 = pnand %p852_p0, %p848_p11 }
  0x3f   : > { %856 = shalt.err (!%p853_p2)
}
  0x40   : > { %700 = dma.hbm_to_vmem [thread:$0]  (!%p1114_p7), %s301_s30, 128, %s303_s20, %s291_s28  }
  0x41   : > { %311 = sbr.rel (%p1057_p3) target bundleno = 258 (0x102), region = 44  ;;  %s1150_s3 = sand.u32 (!%p1057_p3), 1, %s974_s25  }
  0x42   : > { %s1153_s23 = sshll.u32 (!%p1057_p3), %s1150_s3, 3  ;;  %s314_s12 = scalar_lea.sflag (!%p1057_p3), [#allocation3], %s1150_s3 }
  0x43   : > { %s317_s27 = scalar_lea.vmem (!%p1057_p3), [#allocation2], %s1153_s23 }
  0x46   : > { %945 = dma.done.wait (%p1090_p12), %s314_s12, 128  }
  0x47   : > { %947 = vsyncadd (%p1090_p12), %s314_s12, 4294967168  ;;  %s323_s9 = sand.u32 1, %s1052_s8   ;;  %s327_s18 = scalar_lea.vmem [#allocation5], %s1153_s23 }
  0x48   : > { %s324_s20 = scalar_lea.sflag [#allocation6], %s323_s9 }
  0x49   : > { %949 = dma.done.wait (%p1090_p12), %s324_s20, 128  }
  0x4a   : > { %951 = vsyncadd (%p1090_p12), %s324_s20, 4294967168 }
  0x4b   : > { %953 = dma.done.wait (%p52_p1), [#allocation6], 2048  }
  0x4c   : > { %955 = vsyncadd (%p52_p1), [#allocation6], 4294965248 }
  0x4d   : > { %957 = dma.done.wait (%p52_p1), [#allocation9], 2048  }
  0x4e   : > { %959 = vsyncadd (%p52_p1), [#allocation9], 4294965248  ;;  %v396_v0 = vld [vmem:[#allocation7 + $0x78] sm:$0xff]  ;;  %v395_v2 = vld [vmem:[#allocation7 + $0x70] sm:$0xff]  ;;  %s667_s29 = sshll.u32 %s1052_s8, 3  ;;  %s371_s17 = scalar_lea.vmem [#allocation10], %s1153_s23 }
  0x4f   : > { %v436_v1 = vld [vmem:[#allocation8 + $0x78] sm:$0xff]  ;;  %401 = vmatpush.msra.mxu0 %v396_v0  ;;  %v435_v3 = vld [vmem:[#allocation8 + $0x70] sm:$0xff]  ;;  %v394_v4 = vld [vmem:[#allocation7 + $0x68] sm:$0xff]  ;;  %s485_s16 = scalar_lea.hbm %s1252_s6, %s667_s29  ;;  %s499_s8 = scalar_lea.hbm %s1253_s7, %s667_s29 }
  0x50   : > { %441 = vmatpush.msra.mxu1 %v436_v1  ;;  %v434_v5 = vld [vmem:[#allocation8 + $0x68] sm:$0xff]  ;;  %v393_v6 = vld [vmem:[#allocation7 + $0x60] sm:$0xff]  ;;  %v392_v8 = vld [vmem:[#allocation7 + $0x58] sm:$0xff]  ;;  %s1193_s2 = sshll.u32 %s371_s17, 4  ;;  %s489_s26 = sshll.u32 %s485_s16, 4  ;;  %s488_s2 = int_to_ptr.vmem [resolvable:$true] %s1193_s2  ;;  %s490_s26 = int_to_ptr.hbm [resolvable:$true] %s489_s26 }
  0x51   : > { %402 = vmatpush.msra.mxu0 %v395_v2  ;;  %v433_v7 = vld [vmem:[#allocation8 + $0x60] sm:$0xff]  ;;  %v432_v9 = vld [vmem:[#allocation8 + $0x58] sm:$0xff]  ;;  %v391_v10 = vld [vmem:[#allocation7 + $0x50] sm:$0xff]  ;;  %s378_s12 = scalar_lea.vmem [#allocation11], %s1153_s23  ;;  %s503_s9 = sshll.u32 %s499_s8, 4  ;;  %s1200_s9 = int_to_ptr.hbm [resolvable:$true] %s503_s9 }
  0x52   : > { %442 = vmatpush.msra.mxu1 %v435_v3  ;;  %v431_v11 = vld [vmem:[#allocation8 + $0x50] sm:$0xff]  ;;  %v390_v12 = vld [vmem:[#allocation7 + $0x48] sm:$0xff]  ;;  %v389_v14 = vld [vmem:[#allocation7 + $0x40] sm:$0xff]  ;;  %s470_s20 = scalar_lea.sflag [#allocation4], %s1150_s3  ;;  %s892_s21 = scalar_lea.hbm %s1252_s6, 16 }
  0x53   : > { %403 = vmatpush.msra.mxu0 %v394_v4  ;;  %v430_v13 = vld [vmem:[#allocation8 + $0x48] sm:$0xff]  ;;  %v429_v15 = vld [vmem:[#allocation8 + $0x40] sm:$0xff]  ;;  %v388_v16 = vld [vmem:[#allocation7 + $0x38] sm:$0xff] }
  0x54   : > { %443 = vmatpush.msra.mxu1 %v434_v5  ;;  %v428_v17 = vld [vmem:[#allocation8 + $0x38] sm:$0xff]  ;;  %v387_v18 = vld [vmem:[#allocation7 + $0x30] sm:$0xff]  ;;  %v386_v20 = vld [vmem:[#allocation7 + $0x28] sm:$0xff] }
  0x55   : > { %404 = vmatpush.msra.mxu0 %v393_v6  ;;  %v427_v19 = vld [vmem:[#allocation8 + $0x30] sm:$0xff]  ;;  %v426_v21 = vld [vmem:[#allocation8 + $0x28] sm:$0xff]  ;;  %v385_v22 = vld [vmem:[#allocation7 + $0x20] sm:$0xff] }
  0x56   : > { %444 = vmatpush.msra.mxu1 %v433_v7  ;;  %v425_v23 = vld [vmem:[#allocation8 + $0x20] sm:$0xff]  ;;  %v384_v24 = vld [vmem:[#allocation7 + $0x18] sm:$0xff]  ;;  %v383_v26 = vld [vmem:[#allocation7 + $0x10] sm:$0xff] }
  0x57   : > { %405 = vmatpush.msra.mxu0 %v392_v8  ;;  %v424_v25 = vld [vmem:[#allocation8 + $0x18] sm:$0xff]  ;;  %v423_v27 = vld [vmem:[#allocation8 + $0x10] sm:$0xff]  ;;  %v382_v28 = vld [vmem:[#allocation7 + $0x8] sm:$0xff] }
  0x58   : > { %445 = vmatpush.msra.mxu1 %v432_v9  ;;  %v422_v29 = vld [vmem:[#allocation8 + $0x8] sm:$0xff]  ;;  %v381_v30 = vld [vmem:[#allocation7] sm:$0xff]  ;;  %v380_v35 = vld [vmem:[%s327_s18] sm:$0xff]  ;;  %s886_s18 = sshra.s32 %s490_s26, 4  ;;  %s887_s18 = int_to_ptr.hbm [resolvable:$true] %s886_s18 }
  0x59   : > { %406 = vmatpush.msra.mxu0 %v391_v10  ;;  %v421_v31 = vld [vmem:[#allocation8] sm:$0xff]  ;;  %s888_s29 = scalar_lea.hbm %s887_s18, 8  ;;  %p893_p7 = scmp.lt.s32.totalorder %s887_s18, %s1252_s6 }
  0x5a   : > { %446 = vmatpush.msra.mxu1 %v431_v11  ;;  %v379_v32 = vld [vmem:[%s317_s27] sm:$0xff]  ;;  %s1196_s27 = sshll.u32 %s378_s12, 4  ;;  %p889_p1 = scmp.ne.s32.totalorder %s887_s18, %s888_s29  ;;  %s502_s27 = int_to_ptr.vmem [resolvable:$true] %s1196_s27 }
  0x5b   : > { %407 = vmatpush.msra.mxu0 %v390_v12  ;;  %v750_v33 = vld [vmem:[%s1250_s4] ss:$0 sm:$0xff]  ;;  %p894_p9 = scmp.lt.s32.totalorder %s892_s21, %s888_s29 }
  0x5c   : > { %447 = vmatpush.msra.mxu1 %v430_v13  ;;  %v751_v34 = vld [vmem:[%s1251_s5] ss:$0 sm:$0xff]  ;;  %p890_p3 = pnand %p889_p1, %p1097_p4 }
  0x5d   : > { %408 = vmatpush.msra.mxu0 %v389_v14  ;;  %p895_p8 = por %p894_p9, %p893_p7 }
  0x5e   : > { %448 = vmatpush.msra.mxu1 %v429_v15  ;;  %p891_p12 = pneg %p890_p3 }
  0x5f   : > { %409 = vmatpush.msra.mxu0 %v388_v16 }
  0x60   : > { %449 = vmatpush.msra.mxu1 %v428_v17  ;;  %p896_p10 = pnand %p895_p8, %p891_p12 }
  0x61   : > { %410 = vmatpush.msra.mxu0 %v387_v18 }
  0x62   : > { %450 = vmatpush.msra.mxu1 %v427_v19 }
  0x63   : > { %411 = vmatpush.msra.mxu0 %v386_v20 }
  0x64   : > { %451 = vmatpush.msra.mxu1 %v426_v21 }
  0x65   : > { %412 = vmatpush.msra.mxu0 %v385_v22 }
  0x66   : > { %452 = vmatpush.msra.mxu1 %v425_v23 }
  0x67   : > { %413 = vmatpush.msra.mxu0 %v384_v24 }
  0x68   : > { %453 = vmatpush.msra.mxu1 %v424_v25 }
  0x69   : > { %414 = vmatpush.msra.mxu0 %v383_v26 }
  0x6a   : > { %454 = vmatpush.msra.mxu1 %v423_v27 }
  0x6b   : > { %415 = vmatpush.msra.mxu0 %v382_v28 }
  0x6c   : > { %455 = vmatpush.msra.mxu1 %v422_v29 }
  0x6d   : > { %416 = vmatpush.msra.mxu0 %v381_v30 }
  0x6e   : > { %456 = vmatpush.msra.mxu1 %v421_v31  ;;  %417 = vmatmul.f32.vlgmr.msra.gmra.mxu0 %v379_v32 }
  0x6f   : > { %457 = vmatmul.f32.vlgmr.msra.gmra.mxu1 %v379_v32 }
  0xeb   : > { %v418_v36 = vpop.f32.mrf.mxu0 }
  0xec   : > { %v458_v37 = vpop.f32.mrf.mxu1  ;;  %v419_v38 = vadd.f32 %v750_v33, %v418_v36 }
  0xed   : > { %v459_v39 = vadd.f32 %v751_v34, %v458_v37 }
  0xee   : > { %v461_v40 = vmul.f32 %v419_v38, %v379_v32  ;;  %v466_v41 = vmul.f32 %v419_v38, %v380_v35 }
  0xef   : > { %v462_v42 = vmul.f32 %v459_v39, %v380_v35  ;;  %v465_v43 = vmul.f32 %v459_v39, %v379_v32 }
  0xf1   : > { %v463_v44 = vsub.f32 %v461_v40, %v462_v42  ;;  %v467_v45 = vadd.f32 %v466_v41, %v465_v43 }
  0xf3   : > { %464 = vst [vmem:[%s371_s17] sm:$0xff] %v463_v44 }
  0xf4   : > { %899 = shalt.err (!%p896_p10)
}
  0xf5   : > { %683 = dma.vmem_to_hbm [thread:$0]  (%p1097_p4), %s488_s2, 128, %s490_s26, %s470_s20   ;;  %468 = vst [vmem:[%s378_s12] sm:$0xff] %v467_v45 }
  0xf6   : > { %s475_s13 = scalar_lea.sflag [#allocation12], %s1150_s3  ;;  %s914_s28 = sshra.s32 %s1200_s9, 4  ;;  %s915_s28 = int_to_ptr.hbm [resolvable:$true] %s914_s28 }
  0xf7   : > { %s916_s16 = scalar_lea.hbm %s915_s28, 8  ;;  %s920_s8 = scalar_lea.hbm %s1253_s7, 16 }
  0xf8   : > { %p917_p11 = scmp.ne.s32.totalorder %s915_s28, %s916_s16  ;;  %p921_p0 = scmp.lt.s32.totalorder %s915_s28, %s1253_s7 }
  0xf9   : > { %p922_p2 = scmp.lt.s32.totalorder %s920_s8, %s916_s16 }
  0xfa   : > { %p918_p5 = pnand %p917_p11, %p1097_p4 }
  0xfb   : > { %p923_p1 = por %p922_p2, %p921_p0 }
  0xfc   : > { %p919_p13 = pneg %p918_p5 }
  0xfe   : > { %p924_p3 = pnand %p923_p1, %p919_p13 }
 0x100   : > { %927 = shalt.err (!%p924_p3)
}
 0x101   : > { %684 = dma.vmem_to_hbm [thread:$0]  (%p1097_p4), %s502_s27, 128, %s1200_s9, %s475_s13  }
 0x102 PF: > { %s1272_s3 = sld [smem:[#allocation20_spill]]  ;;  %s515_s2 = sand.u32 1, %s970_s24  }
 0x103   : > { %s516_s26 = scalar_lea.sflag [#allocation4], %s515_s2 }
 0x108   : > { %p1273_p12 = scmp.ge.s32.totalorder %s1272_s3, 2 }
 0x10a   : > { %p702_p7 = pnand %p1273_p12, %p1101_p6 }
 0x10c   : > { %p703_p9 = pneg %p702_p7 }
 0x10e   : > { %961 = dma.done.wait (%p703_p9), %s516_s26, 128  }
 0x10f   : > { %963 = vsyncadd (%p703_p9), %s516_s26, 4294967168  ;;  %s526_s12 = scalar_lea.sflag [#allocation12], %s515_s2 }
 0x110   : > { %965 = dma.done.wait (%p703_p9), %s526_s12, 128  }
 0x111   : > { %967 = vsyncadd (%p703_p9), %s526_s12, 4294967168  ;;  %s1274_s27 = sld [smem:[#allocation21_spill]]  ;;  %s1277_s24 = smov %s974_s25 }
 0x112   : > { %s1275_s10 = sld [smem:[#allocation19_spill]] }
 0x113   : > { %s1276_s26 = sld [smem:[#allocation22_spill]] }
 0x117   : > { %p28_p4 = scmp.ge.s32.totalorder %s1274_s27, 4  }
 0x118   : > { %s1278_s25 = smov %s1275_s10 }
 0x119   :  { %30 = sbr.rel (!%p28_p4) target bundleno = 13 (0xd), region = 127 }
 0x11e   :  { %532 = vsyncpa [#allocation3], 1 }
 0x11f   :  { %534 = vsyncpa [#allocation3 + $0x1], 1 }
 0x120   :  { %535 = vsyncpa [#allocation6], 1 }
 0x121   :  { %537 = vsyncpa [#allocation6 + $0x1], 1 }
 0x122   :  { %538 = vsyncpa [#allocation9], 1 }
 0x123   :  { %539 = vsyncpa [#allocation4], 1 }
 0x124   :  { %541 = vsyncpa [#allocation4 + $0x1], 1 }
 0x125   :  { %542 = vsyncpa [#allocation12], 1 }
 0x126   :  { %544 = vsyncpa [#allocation12 + $0x1], 1 }

</bundles_post_ra>
